<compile_context>
chip_gen: v5e
topology: v5e:2x2
jax: 0.10.0
libtpu: 0.0.40
codegen_flags: <defaults>
</compile_context>

<pallas_src>
import functools

import jax
import jax.numpy as jnp
from jax.experimental import pallas as pl
from jax.experimental.pallas import tpu as pltpu


def _round_up(a, b):
    return (a + b - 1) // b * b


# -----------------------------------------------------------------------------
# Kernels
# -----------------------------------------------------------------------------
def _resmlp_kernel(x_ref, w_ref, b_ref, o_ref, *, compute_dtype):
    """One (tm, K) row tile: o = leaky_relu(x @ W + b, 0.1). W is (K, N)."""
    x = x_ref[...]
    if compute_dtype is not None:
        x = x.astype(compute_dtype)
    y = jnp.dot(x, w_ref[...], preferred_element_type=jnp.float32)
    y = y + b_ref[...].astype(jnp.float32)     # bias broadcast over rows (f32)
    y = jnp.maximum(y, 0.1 * y)                # LeakyReLU(0.1): one vmul + vmax
    o_ref[...] = y.astype(o_ref.dtype)


def _resmlp_ktiled_kernel(x_ref, w_ref, b_ref, o_ref, acc_ref, *, compute_dtype):
    """K-tiled fallback: accumulate partial products, finalize on last K step."""
    k = pl.program_id(1)

    @pl.when(k == 0)
    def _():
        acc_ref[...] = jnp.zeros_like(acc_ref)

    x = x_ref[...]
    if compute_dtype is not None:
        x = x.astype(compute_dtype)
    acc_ref[...] += jnp.dot(x, w_ref[...], preferred_element_type=jnp.float32)

    @pl.when(k == pl.num_programs(1) - 1)
    def _():
        y = acc_ref[...] + b_ref[...].astype(jnp.float32)
        y = jnp.maximum(y, 0.1 * y)
        o_ref[...] = y.astype(o_ref.dtype)


# -----------------------------------------------------------------------------
# Wrapper
# -----------------------------------------------------------------------------
def _vmem_budget_and_limit():
    try:
        cap = int(pltpu.get_tpu_info().vmem_capacity_bytes)
    except Exception:              # non-TPU host / older API: assume v7x-sized VMEM
        cap = 64 * 1024 * 1024
    budget = int(cap * 0.70)                       # footprint budget (headroom)
    limit = min(int(cap * 0.85), cap - (4 * 1024 * 1024))
    return budget, limit


def _resmlp_ktiled(x2d, w_kn, b2d, out_dtype, compute_dtype,
                   vmem_budget, vmem_limit, tm):
    """Fallback when the full (K, N) weight cannot stay VMEM-resident."""
    M, K = x2d.shape
    _, N = w_kn.shape
    x_item = jnp.dtype(x2d.dtype).itemsize
    w_item = jnp.dtype(w_kn.dtype).itemsize
    o_item = jnp.dtype(out_dtype).itemsize

    def fits(t, tk):
        return (2 * t * tk * x_item       # x tiles (double-buffered)
                + 2 * tk * N * w_item     # weight K-slabs (double-buffered)
                + 2 * t * N * o_item      # out tiles (double-buffered)
                + t * N * 4               # f32 accumulator scratch
                + t * N * 4               # f32 matmul intermediate
                + 2 * N * 4               # bias
                ) <= vmem_budget

    tm_eff = _round_up(min(tm, _round_up(M, 8)), 8)
    tk = 512
    while not fits(tm_eff, tk):
        if tk > 128:
            tk //= 2
        elif tm_eff > 8:
            tm_eff = _round_up(tm_eff // 2, 8)
        else:
            break
    # TODO(synk): also tile N (second accumulator axis) for n_feats so large
    # that even a (128, N) weight slab does not fit in VMEM.

    # Zero-pad K once (weight AND x) so a ragged last K tile never mixes
    # unspecified out-of-bounds reads into the accumulator.
    K_pad = _round_up(K, tk)
    if K_pad != K:
        x2d = jnp.pad(x2d, ((0, 0), (0, K_pad - K)))
        w_kn = jnp.pad(w_kn, ((0, K_pad - K), (0, 0)))

    kern = functools.partial(_resmlp_ktiled_kernel, compute_dtype=compute_dtype)
    return pl.pallas_call(
        kern,
        out_shape=jax.ShapeDtypeStruct((M, N), out_dtype),
        grid_spec=pltpu.PrefetchScalarGridSpec(
            num_scalar_prefetch=0,
            grid=(pl.cdiv(M, tm_eff), K_pad // tk),      # reduction axis last
            in_specs=[
                pl.BlockSpec((tm_eff, tk), lambda i, k: (i, k)),
                pl.BlockSpec((tk, N), lambda i, k: (k, 0)),
                pl.BlockSpec((1, N), lambda i, k: (0, 0)),
            ],
            out_specs=pl.BlockSpec((tm_eff, N), lambda i, k: (i, 0)),
            scratch_shapes=[pltpu.VMEM((tm_eff, N), jnp.float32)],
        ),
        compiler_params=pltpu.CompilerParams(
            dimension_semantics=("parallel", "arbitrary"),
            vmem_limit_bytes=vmem_limit,
        ),
    )(x2d, w_kn, b2d)


def resmlp_forward(x, weight, bias, *, tm=512, use_bf16=False):
    """ResMLP forward: leaky_relu(x @ weight.T + bias, 0.1).

    x: (..., n_feats); weight: (n_feats, n_feats) torch (out, in) layout;
    bias: (n_feats,). Returns same shape/dtype as x.
    """
    N, K = weight.shape
    orig_shape = x.shape
    x2d = x.reshape(-1, K)
    M = x2d.shape[0]

    # One-time layout fix: torch (out, in) -> (in, out); costs one N*K HBM pass
    # (negligible vs. streaming x) and keeps the kernel on the native MXU path.
    w_kn = weight.T
    compute_dtype = None
    if use_bf16:
        w_kn = w_kn.astype(jnp.bfloat16)
        compute_dtype = jnp.bfloat16
    b2d = bias.reshape(1, N)
    # TODO(synk): if n_feats is not a multiple of the MXU tile (256 on v6e/v7x),
    # a one-time wrapper-side pad of the weight K/N would avoid underfilled
    # MXU passes; skipped here since it forces an extra output slice.

    vmem_budget, vmem_limit = _vmem_budget_and_limit()
    x_item = jnp.dtype(x.dtype).itemsize
    w_item = jnp.dtype(w_kn.dtype).itemsize
    o_item = x_item

    def fits_resident(t):
        return (2 * t * K * x_item        # x row tiles (double-buffered)
                + 2 * t * N * o_item      # out tiles (double-buffered)
                + t * N * 4               # f32 matmul/activation intermediate
                + K * N * w_item          # resident weight (single buffer)
                + 2 * N * 4               # bias
                ) <= vmem_budget

    tm_eff = _round_up(min(tm, _round_up(M, 8)), 8)
    while tm_eff > 8 and not fits_resident(tm_eff):
        tm_eff = _round_up(tm_eff // 2, 8)

    if not fits_resident(tm_eff):
        out2d = _resmlp_ktiled(x2d, w_kn, b2d, x.dtype, compute_dtype,
                               vmem_budget, vmem_limit, tm)
        return out2d.reshape(orig_shape)

    # v7x has 2 TensorCores; for large M make sure the "parallel" grid has at
    # least 2 steps so both cores get work (no effect on tiny inputs / 1 TC).
    if M >= 256 and pl.cdiv(M, tm_eff) < 2:
        tm_eff = max(8, _round_up(pl.cdiv(M, 2), 8))

    grid = (pl.cdiv(M, tm_eff),)       # ragged last row tile masked by Pallas
    kern = functools.partial(_resmlp_kernel, compute_dtype=compute_dtype)

    def call(buffered_one):
        const_kw = {"pipeline_mode": pl.Buffered(1)} if buffered_one else {}
        return pl.pallas_call(
            kern,
            out_shape=jax.ShapeDtypeStruct((M, N), x.dtype),
            grid_spec=pltpu.PrefetchScalarGridSpec(
                num_scalar_prefetch=0,
                grid=grid,
                in_specs=[
                    pl.BlockSpec((tm_eff, K), lambda i: (i, 0)),         # x tile
                    pl.BlockSpec((K, N), lambda i: (0, 0), **const_kw),  # weight
                    pl.BlockSpec((1, N), lambda i: (0, 0), **const_kw),  # bias
                ],
                out_specs=pl.BlockSpec((tm_eff, N), lambda i: (i, 0)),
            ),
            compiler_params=pltpu.CompilerParams(
                dimension_semantics=("parallel",),
                vmem_limit_bytes=vmem_limit,
            ),
        )(x2d, w_kn, b2d)

    try:
        out2d = call(True)      # single-buffer the constant weight/bias blocks
    except Exception:
        out2d = call(False)     # JAX version without pipeline_mode/Buffered(1)

    return out2d.reshape(orig_shape)


# -----------------------------------------------------------------------------
# Reference & self-test
# -----------------------------------------------------------------------------
def _reference(x, weight, bias):
    y = jnp.einsum("...k,nk->...n", x, weight) + bias
    return jnp.where(y >= 0, y, 0.1 * y)


if __name__ == "__main__":
    n_feats = 256
    key = jax.random.PRNGKey(0)
    kx, kw, kb, kx2 = jax.random.split(key, 4)

    bound = 1.0 / jnp.sqrt(n_feats)
    weight = jax.random.uniform(kw, (n_feats, n_feats), jnp.float32, -bound, bound)
    bias = jax.random.uniform(kb, (n_feats,), jnp.float32, -bound, bound)

    # Case 1: aligned M (batch=2, seq=8, n_feats).
    x = jax.random.normal(kx, (2, 8, n_feats), dtype=jnp.float32)
    out = jax.block_until_ready(resmlp_forward(x, weight, bias))
    ref = _reference(x, weight, bias)
    assert out.shape == x.shape
    assert jnp.allclose(out, ref, atol=1e-4, rtol=1e-4), "f32 mismatch (aligned M)"

    # Case 2: ragged M (3*5 = 15 rows) exercises the masked last row tile.
    x2 = jax.random.normal(kx2, (3, 5, n_feats), dtype=jnp.float32)
    out2 = jax.block_until_ready(resmlp_forward(x2, weight, bias))
    ref2 = _reference(x2, weight, bias)
    assert out2.shape == x2.shape
    assert jnp.allclose(out2, ref2, atol=1e-4, rtol=1e-4), "f32 mismatch (ragged M)"

    # Case 3: bf16 MXU fast path (f32 accumulation), relaxed tolerance.
    out_bf = jax.block_until_ready(resmlp_forward(x, weight, bias, use_bf16=True))
    assert jnp.allclose(out_bf, ref, atol=5e-2, rtol=5e-2), "bf16 mismatch"

    print("KERNEL_OK")
</pallas_src>

<mosaic_0001>
module attributes {stable_mosaic.version = 11 : i64} {
  func.func @_resmlp_kernel(%arg0: i32, %arg1: memref<16x256xf32, #tpu.memory_space<vmem>>, %arg2: memref<256x256xf32, #tpu.memory_space<vmem>>, %arg3: memref<1x256xf32, #tpu.memory_space<vmem>>, %arg4: memref<16x256xf32, #tpu.memory_space<vmem>>) attributes {dimension_semantics = [#tpu.dimension_semantics<parallel>], iteration_bounds = array<i64: 1>, scalar_prefetch = 0 : i64, scratch_operands = 0 : i64, tpu.core_type = #tpu.core_type<tc>, window_params = [{transform_indices = @transform_0, window_bounds = array<i64: 16, 256>}, {pipeline_mode = #tpu.pipeline_mode<synchronous>, transform_indices = @transform_1, window_bounds = array<i64: 256, 256>}, {pipeline_mode = #tpu.pipeline_mode<synchronous>, transform_indices = @transform_2, window_bounds = array<i64: 1, 256>}, {transform_indices = @transform_3, window_bounds = array<i64: 16, 256>}]} {
    %c0 = arith.constant 0 : index
    %c0_0 = arith.constant 0 : index
    %0 = vector.load %arg1[%c0, %c0_0] : memref<16x256xf32, #tpu.memory_space<vmem>>, vector<16x256xf32>
    %c0_1 = arith.constant 0 : index
    %c0_2 = arith.constant 0 : index
    %1 = vector.load %arg2[%c0_1, %c0_2] : memref<256x256xf32, #tpu.memory_space<vmem>>, vector<256x256xf32>
    %cst = arith.constant dense<0.000000e+00> : vector<16x256xf32>
    %2 = tpu.matmul %0, %1, %cst {dimension_numbers = #tpu.dot_dimension_numbers<[1], [0], [0], [1], [0, 0, 1, 1], [], []>} : vector<16x256xf32>, vector<256x256xf32>, vector<16x256xf32> -> vector<16x256xf32>
    %c0_3 = arith.constant 0 : index
    %c0_4 = arith.constant 0 : index
    %3 = vector.load %arg3[%c0_3, %c0_4] : memref<1x256xf32, #tpu.memory_space<vmem>>, vector<1x256xf32>
    %4 = vector.broadcast %3 : vector<1x256xf32> to vector<16x256xf32>
    %5 = arith.addf %2, %4 : vector<16x256xf32>
    %cst_5 = arith.constant 1.000000e-01 : f32
    %6 = vector.broadcast %cst_5 : f32 to vector<16x256xf32>
    %7 = arith.mulf %6, %5 : vector<16x256xf32>
    %8 = arith.maximumf %5, %7 : vector<16x256xf32>
    %c0_6 = arith.constant 0 : index
    %c0_7 = arith.constant 0 : index
    %9 = vector.load %arg4[%c0_6, %c0_7] : memref<16x256xf32, #tpu.memory_space<vmem>>, vector<16x256xf32>
    tpu.vector_store %arg4[%c0_6, %c0_7], %8 {strides = array<i32>} : memref<16x256xf32, #tpu.memory_space<vmem>>, vector<16x256xf32>,
    return
  }
  func.func @transform_0(%arg0: i32) -> (i32, i32) {
    %c0_i32 = arith.constant 0 : i32
    %c0_i32_0 = arith.constant 0 : i32
    return %arg0, %c0_i32 : i32, i32
  }
  func.func @transform_1(%arg0: i32) -> (i32, i32) {
    %c0_i32 = arith.constant 0 : i32
    %c0_i32_0 = arith.constant 0 : i32
    %c0_i32_1 = arith.constant 0 : i32
    return %c0_i32, %c0_i32_0 : i32, i32
  }
  func.func @transform_2(%arg0: i32) -> (i32, i32) {
    %c0_i32 = arith.constant 0 : i32
    %c0_i32_0 = arith.constant 0 : i32
    %c0_i32_1 = arith.constant 0 : i32
    return %c0_i32, %c0_i32_0 : i32, i32
  }
  func.func @transform_3(%arg0: i32) -> (i32, i32) {
    %c0_i32 = arith.constant 0 : i32
    %c0_i32_0 = arith.constant 0 : i32
    return %arg0, %c0_i32 : i32, i32
  }
}

module attributes {stable_mosaic.version = 11 : i64} {
  func.func @_resmlp_kernel(%arg0: i32, %arg1: memref<16x256xf32, #tpu.memory_space<vmem>>, %arg2: memref<256x256xf32, #tpu.memory_space<vmem>>, %arg3: memref<1x256xf32, #tpu.memory_space<vmem>>, %arg4: memref<16x256xf32, #tpu.memory_space<vmem>>) attributes {dimension_semantics = [#tpu.dimension_semantics<parallel>], iteration_bounds = array<i64: 1>, scalar_prefetch = 0 : i64, scratch_operands = 0 : i64, tpu.core_type = #tpu.core_type<tc>, window_params = [{transform_indices = @transform_0, window_bounds = array<i64: 16, 256>}, {pipeline_mode = #tpu.pipeline_mode<synchronous>, transform_indices = @transform_1, window_bounds = array<i64: 256, 256>}, {pipeline_mode = #tpu.pipeline_mode<synchronous>, transform_indices = @transform_2, window_bounds = array<i64: 1, 256>}, {transform_indices = @transform_3, window_bounds = array<i64: 16, 256>}]} {
    %c0 = arith.constant 0 : index
    %c0_0 = arith.constant 0 : index
    %0 = vector.load %arg1[%c0, %c0_0] : memref<16x256xf32, #tpu.memory_space<vmem>>, vector<16x256xf32>
    %c0_1 = arith.constant 0 : index
    %c0_2 = arith.constant 0 : index
    %1 = vector.load %arg2[%c0_1, %c0_2] : memref<256x256xf32, #tpu.memory_space<vmem>>, vector<256x256xf32>
    %cst = arith.constant dense<0.000000e+00> : vector<16x256xf32>
    %2 = tpu.matmul %0, %1, %cst {dimension_numbers = #tpu.dot_dimension_numbers<[1], [0], [0], [1], [0, 0, 1, 1], [], []>} : vector<16x256xf32>, vector<256x256xf32>, vector<16x256xf32> -> vector<16x256xf32>
    %c0_3 = arith.constant 0 : index
    %c0_4 = arith.constant 0 : index
    %3 = vector.load %arg3[%c0_3, %c0_4] : memref<1x256xf32, #tpu.memory_space<vmem>>, vector<1x256xf32>
    %4 = vector.broadcast %3 : vector<1x256xf32> to vector<16x256xf32>
    %5 = arith.addf %2, %4 : vector<16x256xf32>
    %cst_5 = arith.constant 1.000000e-01 : f32
    %6 = vector.broadcast %cst_5 : f32 to vector<16x256xf32>
    %7 = arith.mulf %6, %5 : vector<16x256xf32>
    %8 = arith.maximumf %5, %7 : vector<16x256xf32>
    %c0_6 = arith.constant 0 : index
    %c0_7 = arith.constant 0 : index
    %9 = vector.load %arg4[%c0_6, %c0_7] : memref<16x256xf32, #tpu.memory_space<vmem>>, vector<16x256xf32>
    tpu.vector_store %arg4[%c0_6, %c0_7], %8 {strides = array<i32>} : memref<16x256xf32, #tpu.memory_space<vmem>>, vector<16x256xf32>,
    return
  }
  func.func @transform_0(%arg0: i32) -> (i32, i32) {
    %c0_i32 = arith.constant 0 : i32
    %c0_i32_0 = arith.constant 0 : i32
    return %arg0, %c0_i32 : i32, i32
  }
  func.func @transform_1(%arg0: i32) -> (i32, i32) {
    %c0_i32 = arith.constant 0 : i32
    %c0_i32_0 = arith.constant 0 : i32
    %c0_i32_1 = arith.constant 0 : i32
    return %c0_i32, %c0_i32_0 : i32, i32
  }
  func.func @transform_2(%arg0: i32) -> (i32, i32) {
    %c0_i32 = arith.constant 0 : i32
    %c0_i32_0 = arith.constant 0 : i32
    %c0_i32_1 = arith.constant 0 : i32
    return %c0_i32, %c0_i32_0 : i32, i32
  }
  func.func @transform_3(%arg0: i32) -> (i32, i32) {
    %c0_i32 = arith.constant 0 : i32
    %c0_i32_0 = arith.constant 0 : i32
    return %arg0, %c0_i32 : i32, i32
  }
}

</mosaic_0001>

<bundles_post_ra>
// kernel: tpu_custom_call.1
= control target key start
LH: loop header
LB: loop body
LE: loop exit
PB: predicated region body
PF: predicated region fallthrough
CT: control target
= control target key end

     0   :  { %8 = vsyncpa [#allocation3], 0  ;;  %s413_s0 = inlined_call_operand.hbm [shape: f32[16,256], index: 0, kind: input, shape index: {}]   ;;  %s414_s1 = inlined_call_operand.hbm [shape: f32[256,256], index: 1, kind: input, shape index: {}]   ;;  %s415_s2 = inlined_call_operand.hbm [shape: f32[1,256], index: 2, kind: input, shape index: {}]   ;;  %s416_s3 = inlined_call_operand.hbm [shape: f32[16,256], index: 3, kind: output, shape index: {}]  }
   0x1   :  { %9 = vsyncpa [#allocation6], 0 }
   0x2   :  { %10 = vsyncpa [#allocation4], 0  ;;  %s28_s14 = sshll.u32 %s414_s1, 4  ;;  %s366_s15 = smov [#allocation5]   ;;  %s29_s14 = int_to_ptr.hbm [resolvable:$true] %s28_s14 }
   0x3   :  { %s30_s16 = sshll.u32 %s366_s15, 4  ;;  %s15_s19 = sshll.u32 %s413_s0, 4  ;;  %s31_s16 = int_to_ptr.vmem [resolvable:$true] %s30_s16  ;;  %s16_s19 = int_to_ptr.hbm [resolvable:$true] %s15_s19 }
   0x4   :  { %s367_s20 = smov 256   ;;  %s368_s21 = smov 16  }
   0x5   :  { %36 = dma.hbm_to_vmem [thread:$0]  %s29_s14, 8192, %s31_s16, [#allocation6], %s367_s20, %s367_s20, %s368_s21  }
   0x6   :  { %s369_s22 = smov [#allocation2]   ;;  %s42_s1 = sshll.u32 %s415_s2, 4  ;;  %s43_s1 = int_to_ptr.hbm [resolvable:$true] %s42_s1 }
   0x7   :  { %s17_s23 = sshll.u32 %s369_s22, 4  ;;  %s370_s0 = smov [#allocation7]   ;;  %s18_s23 = int_to_ptr.vmem [resolvable:$true] %s17_s23 }
   0x8   :  { %23 = dma.hbm_to_vmem [thread:$0]  %s16_s19, 512, %s18_s23, [#allocation3], %s367_s20, %s367_s20, %s368_s21  }
   0x9   :  { %s44_s26 = sshll.u32 %s370_s0, 4  ;;  %s45_s26 = int_to_ptr.vmem [resolvable:$true] %s44_s26 }
   0xa   :  { %47 = dma.hbm_to_vmem [thread:$0]  %s43_s1, 32, %s45_s26, [#allocation6]  }
   0xb   :  { %360 = dma.done.wait [#allocation3], 512  }
   0xc   :  { %361 = vsyncadd [#allocation3], 4294966784 }
   0xd   :  { %362 = dma.done.wait [#allocation6], 8224  }
   0xe   :  { %363 = vsyncadd [#allocation6], 4294959072  ;;  %v95_v0 = vld [vmem:[#allocation5 + $0xf8] sm:$0xff]  ;;  %v93_v1 = vld [vmem:[#allocation5 + $0xe8] sm:$0xff]  ;;  %s371_s2 = smov [#allocation8]   ;;  %s244_s30 = sshll.u32 %s416_s3, 4  ;;  %s245_s30 = int_to_ptr.hbm [resolvable:$true] %s244_s30 }
   0xf   :  { %v127_v2 = vld [vmem:[#allocation5 + $0x1f8] sm:$0xff]  ;;  %180 = vmatpush.msra.mxu2 %v95_v0  ;;  %v94_v3 = vld [vmem:[#allocation5 + $0xf0] sm:$0xff]  ;;  %v125_v4 = vld [vmem:[#allocation5 + $0x1e8] sm:$0xff]  ;;  %s242_s27 = sshll.u32 %s371_s2, 4  ;;  %s243_s27 = int_to_ptr.vmem [resolvable:$true] %s242_s27 }
  0x10   :  { %203 = vmatpush.msra.mxu3 %v127_v2  ;;  %134 = vmatpush.msra.mxu0 %v94_v3  ;;  %v91_v5 = vld [vmem:[#allocation5 + $0xd8] sm:$0xff]  ;;  %v92_v6 = vld [vmem:[#allocation5 + $0xe0] sm:$0xff]  ;;  %v126_v7 = vld [vmem:[#allocation5 + $0x1f0] sm:$0xff] }
  0x11   :  { %181 = vmatpush.msra.mxu2 %v93_v1  ;;  %v123_v8 = vld [vmem:[#allocation5 + $0x1d8] sm:$0xff]  ;;  %v90_v9 = vld [vmem:[#allocation5 + $0xd0] sm:$0xff]  ;;  %v124_v10 = vld [vmem:[#allocation5 + $0x1e0] sm:$0xff]  ;;  %157 = vmatpush.msra.mxu1 %v126_v7 }
  0x12   :  { %204 = vmatpush.msra.mxu3 %v125_v4  ;;  %135 = vmatpush.msra.mxu0 %v92_v6  ;;  %v89_v11 = vld [vmem:[#allocation5 + $0xc8] sm:$0xff]  ;;  %v88_v13 = vld [vmem:[#allocation5 + $0xc0] sm:$0xff]  ;;  %v122_v14 = vld [vmem:[#allocation5 + $0x1d0] sm:$0xff] }
  0x13   :  { %v121_v12 = vld [vmem:[#allocation5 + $0x1c8] sm:$0xff]  ;;  %182 = vmatpush.msra.mxu2 %v91_v5  ;;  %158 = vmatpush.msra.mxu1 %v124_v10  ;;  %v87_v15 = vld [vmem:[#allocation5 + $0xb8] sm:$0xff]  ;;  %v86_v17 = vld [vmem:[#allocation5 + $0xb0] sm:$0xff] }
  0x14   :  { %205 = vmatpush.msra.mxu3 %v123_v8  ;;  %136 = vmatpush.msra.mxu0 %v90_v9  ;;  %v119_v16 = vld [vmem:[#allocation5 + $0x1b8] sm:$0xff]  ;;  %v120_v18 = vld [vmem:[#allocation5 + $0x1c0] sm:$0xff]  ;;  %v85_v19 = vld [vmem:[#allocation5 + $0xa8] sm:$0xff] }
  0x15   :  { %183 = vmatpush.msra.mxu2 %v89_v11  ;;  %159 = vmatpush.msra.mxu1 %v122_v14  ;;  %v117_v20 = vld [vmem:[#allocation5 + $0x1a8] sm:$0xff]  ;;  %v84_v21 = vld [vmem:[#allocation5 + $0xa0] sm:$0xff]  ;;  %v118_v22 = vld [vmem:[#allocation5 + $0x1b0] sm:$0xff] }
  0x16   :  { %206 = vmatpush.msra.mxu3 %v121_v12  ;;  %137 = vmatpush.msra.mxu0 %v88_v13  ;;  %v83_v23 = vld [vmem:[#allocation5 + $0x98] sm:$0xff]  ;;  %v82_v25 = vld [vmem:[#allocation5 + $0x90] sm:$0xff]  ;;  %v116_v26 = vld [vmem:[#allocation5 + $0x1a0] sm:$0xff] }
  0x17   :  { %184 = vmatpush.msra.mxu2 %v87_v15  ;;  %160 = vmatpush.msra.mxu1 %v120_v18  ;;  %v115_v24 = vld [vmem:[#allocation5 + $0x198] sm:$0xff]  ;;  %v81_v27 = vld [vmem:[#allocation5 + $0x88] sm:$0xff]  ;;  %v80_v29 = vld [vmem:[#allocation5 + $0x80] sm:$0xff] }
  0x18   :  { %207 = vmatpush.msra.mxu3 %v119_v16  ;;  %138 = vmatpush.msra.mxu0 %v86_v17  ;;  %v113_v28 = vld [vmem:[#allocation5 + $0x188] sm:$0xff]  ;;  %v114_v30 = vld [vmem:[#allocation5 + $0x190] sm:$0xff]  ;;  %v79_v31 = vld [vmem:[#allocation5 + $0x78] sm:$0xff] }
  0x19   :  { %185 = vmatpush.msra.mxu2 %v85_v19  ;;  %161 = vmatpush.msra.mxu1 %v118_v22  ;;  %v111_v32 = vld [vmem:[#allocation5 + $0x178] sm:$0xff]  ;;  %v78_v33 = vld [vmem:[#allocation5 + $0x70] sm:$0xff]  ;;  %v112_v34 = vld [vmem:[#allocation5 + $0x180] sm:$0xff] }
  0x1a   :  { %208 = vmatpush.msra.mxu3 %v117_v20  ;;  %139 = vmatpush.msra.mxu0 %v84_v21  ;;  %v77_v35 = vld [vmem:[#allocation5 + $0x68] sm:$0xff]  ;;  %v76_v37 = vld [vmem:[#allocation5 + $0x60] sm:$0xff]  ;;  %v110_v38 = vld [vmem:[#allocation5 + $0x170] sm:$0xff] }
  0x1b   :  { %186 = vmatpush.msra.mxu2 %v83_v23  ;;  %162 = vmatpush.msra.mxu1 %v116_v26  ;;  %v109_v36 = vld [vmem:[#allocation5 + $0x168] sm:$0xff]  ;;  %v75_v39 = vld [vmem:[#allocation5 + $0x58] sm:$0xff]  ;;  %v74_v41 = vld [vmem:[#allocation5 + $0x50] sm:$0xff] }
  0x1c   :  { %209 = vmatpush.msra.mxu3 %v115_v24  ;;  %140 = vmatpush.msra.mxu0 %v82_v25  ;;  %v107_v40 = vld [vmem:[#allocation5 + $0x158] sm:$0xff]  ;;  %v108_v42 = vld [vmem:[#allocation5 + $0x160] sm:$0xff]  ;;  %v73_v43 = vld [vmem:[#allocation5 + $0x48] sm:$0xff] }
  0x1d   :  { %187 = vmatpush.msra.mxu2 %v81_v27  ;;  %163 = vmatpush.msra.mxu1 %v114_v30  ;;  %v105_v44 = vld [vmem:[#allocation5 + $0x148] sm:$0xff]  ;;  %v72_v45 = vld [vmem:[#allocation5 + $0x40] sm:$0xff]  ;;  %v106_v46 = vld [vmem:[#allocation5 + $0x150] sm:$0xff] }
  0x1e   :  { %210 = vmatpush.msra.mxu3 %v113_v28  ;;  %141 = vmatpush.msra.mxu0 %v80_v29  ;;  %v71_v47 = vld [vmem:[#allocation5 + $0x38] sm:$0xff]  ;;  %v70_v49 = vld [vmem:[#allocation5 + $0x30] sm:$0xff]  ;;  %v104_v50 = vld [vmem:[#allocation5 + $0x140] sm:$0xff] }
  0x1f   :  { %188 = vmatpush.msra.mxu2 %v79_v31  ;;  %164 = vmatpush.msra.mxu1 %v112_v34  ;;  %v103_v48 = vld [vmem:[#allocation5 + $0x138] sm:$0xff]  ;;  %v69_v51 = vld [vmem:[#allocation5 + $0x28] sm:$0xff]  ;;  %v68_v53 = vld [vmem:[#allocation5 + $0x20] sm:$0xff] }
  0x20   :  { %211 = vmatpush.msra.mxu3 %v111_v32  ;;  %142 = vmatpush.msra.mxu0 %v78_v33  ;;  %v101_v52 = vld [vmem:[#allocation5 + $0x128] sm:$0xff]  ;;  %v102_v54 = vld [vmem:[#allocation5 + $0x130] sm:$0xff]  ;;  %v67_v55 = vld [vmem:[#allocation5 + $0x18] sm:$0xff] }
  0x21   :  { %189 = vmatpush.msra.mxu2 %v77_v35  ;;  %165 = vmatpush.msra.mxu1 %v110_v38  ;;  %v99_v56 = vld [vmem:[#allocation5 + $0x118] sm:$0xff]  ;;  %v66_v57 = vld [vmem:[#allocation5 + $0x10] sm:$0xff]  ;;  %v100_v58 = vld [vmem:[#allocation5 + $0x120] sm:$0xff] }
  0x22   :  { %212 = vmatpush.msra.mxu3 %v109_v36  ;;  %143 = vmatpush.msra.mxu0 %v76_v37  ;;  %v65_v59 = vld [vmem:[#allocation5 + $0x8] sm:$0xff]  ;;  %v60_v61 = vld [vmem:[#allocation2] sm:$0xff]  ;;  %v98_v0 = vld [vmem:[#allocation5 + $0x110] sm:$0xff] }
  0x23   :  { %190 = vmatpush.msra.mxu2 %v75_v39  ;;  %166 = vmatpush.msra.mxu1 %v108_v42  ;;  %v97_v60 = vld [vmem:[#allocation5 + $0x108] sm:$0xff]  ;;  %v64_v63 = vld [vmem:[#allocation5] sm:$0xff]  ;;  %v62_v2 = vld [vmem:[#allocation2 + $0x10] sm:$0xff] }
  0x24   :  { %213 = vmatpush.msra.mxu3 %v107_v40  ;;  %144 = vmatpush.msra.mxu0 %v74_v41  ;;  %v61_v62 = vld [vmem:[#allocation2 + $0x8] sm:$0xff]  ;;  %v96_v1 = vld [vmem:[#allocation5 + $0x100] sm:$0xff]  ;;  %v63_v3 = vld [vmem:[#allocation2 + $0x18] sm:$0xff] }
  0x25   :  { %191 = vmatpush.msra.mxu2 %v73_v43  ;;  %167 = vmatpush.msra.mxu1 %v106_v46  ;;  %v128_v4 = vld [vmem:[#allocation7] sm:$0x3] }
  0x26   :  { %214 = vmatpush.msra.mxu3 %v105_v44  ;;  %145 = vmatpush.msra.mxu0 %v72_v45  ;;  %v130_v5 = vperm.slane %v128_v4, 0  ;;  %v131_v8 = vperm.slane %v128_v4, 1 }
  0x27   :  { %192 = vmatpush.msra.mxu2 %v71_v47  ;;  %168 = vmatpush.msra.mxu1 %v104_v50 }
  0x28   :  { %215 = vmatpush.msra.mxu3 %v103_v48  ;;  %146 = vmatpush.msra.mxu0 %v70_v49 }
  0x29   :  { %193 = vmatpush.msra.mxu2 %v69_v51  ;;  %169 = vmatpush.msra.mxu1 %v102_v54 }
  0x2a   :  { %216 = vmatpush.msra.mxu3 %v101_v52  ;;  %147 = vmatpush.msra.mxu0 %v68_v53 }
  0x2b   :  { %194 = vmatpush.msra.mxu2 %v67_v55  ;;  %170 = vmatpush.msra.mxu1 %v100_v58 }
  0x2c   :  { %217 = vmatpush.msra.mxu3 %v99_v56  ;;  %148 = vmatpush.msra.mxu0 %v66_v57 }
  0x2d   :  { %195 = vmatpush.msra.mxu2 %v65_v59  ;;  %171 = vmatpush.msra.mxu1 %v98_v0 }
  0x2e   :  { %218 = vmatpush.msra.mxu3 %v97_v60  ;;  %196 = vmatmul.f32.vlgmr.msra.gmra.mxu2 %v60_v61 }
  0x2f   :  { %219 = vmatmul.f32.vlgmr.msra.gmra.mxu3 %v61_v62  ;;  %149 = vmatpush.msra.mxu0 %v64_v63 }
  0x30   :  { %150 = vmatmul.f32.vlgmr.msra.gmra.mxu0 %v60_v61  ;;  %172 = vmatpush.msra.mxu1 %v96_v1 }
  0x31   :  { %173 = vmatmul.f32.vlgmr.msra.gmra.mxu1 %v61_v62 }
  0x36   :  { %199 = vmatmul.f32.gmra.mxu2 %v62_v2 }
  0x37   :  { %222 = vmatmul.f32.gmra.mxu3 %v63_v3 }
  0x38   :  { %153 = vmatmul.f32.gmra.mxu0 %v62_v2 }
  0x39   :  { %176 = vmatmul.f32.gmra.mxu1 %v63_v3 }
  0xad   :  { %v151_v6 = vpop.f32.mrf.mxu0 }
  0xae   :  { %v152_v7 = vadd.f32 %v151_v6, %v130_v5  ;;  %v174_v9 = vpop.f32.mrf.mxu1 }
  0xb0   :  { %v175_v10 = vadd.f32 %v174_v9, %v152_v7 }
  0xb1   :  { %v197_v11 = vpop.f32.mrf.mxu2 }
  0xb2   :  { %v220_v12 = vpop.f32.mrf.mxu3  ;;  %v226_v13 = vmul.f32 0.1, %v175_v10  ;;  %v198_v14 = vadd.f32 %v197_v11, %v131_v8 }
  0xb4   :  { %v230_v15 = vmax.f32 %v175_v10, %v226_v13  ;;  %v221_v16 = vadd.f32 %v220_v12, %v198_v14 }
  0xb5   :  { %v154_v17 = vpop.f32.mrf.mxu0 }
  0xb6   :  { %234 = vst [vmem:[#allocation8] sm:$0xff] %v230_v15  ;;  %v227_v18 = vmul.f32 0.1, %v221_v16  ;;  %v155_v19 = vadd.f32 %v154_v17, %v130_v5  ;;  %v177_v20 = vpop.f32.mrf.mxu1 }
  0xb8   :  { %v231_v21 = vmax.f32 %v221_v16, %v227_v18  ;;  %v178_v22 = vadd.f32 %v177_v20, %v155_v19 }
  0xb9   :  { %v200_v23 = vpop.f32.mrf.mxu2 }
  0xba   :  { %v223_v24 = vpop.f32.mrf.mxu3  ;;  %235 = vst [vmem:[#allocation8 + $0x8] sm:$0xff] %v231_v21  ;;  %v228_v25 = vmul.f32 0.1, %v178_v22  ;;  %v201_v26 = vadd.f32 %v200_v23, %v131_v8 }
  0xbc   :  { %v232_v27 = vmax.f32 %v178_v22, %v228_v25  ;;  %v224_v28 = vadd.f32 %v223_v24, %v201_v26 }
  0xbe   :  { %236 = vst [vmem:[#allocation8 + $0x10] sm:$0xff] %v232_v27  ;;  %v229_v29 = vmul.f32 0.1, %v224_v28 }
  0xc0   :  { %v233_v30 = vmax.f32 %v224_v28, %v229_v29 }
  0xc2   :  { %237 = vst [vmem:[#allocation8 + $0x18] sm:$0xff] %v233_v30 }
  0xc3   :  { %250 = dma.vmem_to_hbm [thread:$0]  %s243_s27, 512, %s245_s30, [#allocation4], %s367_s20, %s367_s20, %s368_s21  }
  0xc4   :  { %364 = dma.done.wait [#allocation4], 512  }
  0xc5   :  { %365 = vsyncadd [#allocation4], 4294966784 }
  0xc6   :  { %255 = vsyncpa [#allocation3], 1 }
  0xc7   :  { %256 = vsyncpa [#allocation6], 1 }
  0xc8   :  { %257 = vsyncpa [#allocation4], 1 }

// kernel: tpu_custom_call.1
= control target key start
LH: loop header
LB: loop body
LE: loop exit
PB: predicated region body
PF: predicated region fallthrough
CT: control target
= control target key end

     0   :  { %8 = vsyncpa [#allocation3], 0  ;;  %s413_s0 = inlined_call_operand.hbm [shape: f32[16,256], index: 0, kind: input, shape index: {}]   ;;  %s414_s1 = inlined_call_operand.hbm [shape: f32[256,256], index: 1, kind: input, shape index: {}]   ;;  %s415_s2 = inlined_call_operand.hbm [shape: f32[1,256], index: 2, kind: input, shape index: {}]   ;;  %s416_s3 = inlined_call_operand.hbm [shape: f32[16,256], index: 3, kind: output, shape index: {}]  }
   0x1   :  { %9 = vsyncpa [#allocation6], 0 }
   0x2   :  { %10 = vsyncpa [#allocation4], 0  ;;  %s28_s14 = sshll.u32 %s414_s1, 4  ;;  %s366_s15 = smov [#allocation5]   ;;  %s29_s14 = int_to_ptr.hbm [resolvable:$true] %s28_s14 }
   0x3   :  { %s30_s16 = sshll.u32 %s366_s15, 4  ;;  %s15_s19 = sshll.u32 %s413_s0, 4  ;;  %s31_s16 = int_to_ptr.vmem [resolvable:$true] %s30_s16  ;;  %s16_s19 = int_to_ptr.hbm [resolvable:$true] %s15_s19 }
   0x4   :  { %s367_s20 = smov 256   ;;  %s368_s21 = smov 16  }
   0x5   :  { %36 = dma.hbm_to_vmem [thread:$0]  %s29_s14, 8192, %s31_s16, [#allocation6], %s367_s20, %s367_s20, %s368_s21  }
   0x6   :  { %s369_s22 = smov [#allocation2]   ;;  %s42_s1 = sshll.u32 %s415_s2, 4  ;;  %s43_s1 = int_to_ptr.hbm [resolvable:$true] %s42_s1 }
   0x7   :  { %s17_s23 = sshll.u32 %s369_s22, 4  ;;  %s370_s0 = smov [#allocation7]   ;;  %s18_s23 = int_to_ptr.vmem [resolvable:$true] %s17_s23 }
   0x8   :  { %23 = dma.hbm_to_vmem [thread:$0]  %s16_s19, 512, %s18_s23, [#allocation3], %s367_s20, %s367_s20, %s368_s21  }
   0x9   :  { %s44_s26 = sshll.u32 %s370_s0, 4  ;;  %s45_s26 = int_to_ptr.vmem [resolvable:$true] %s44_s26 }
   0xa   :  { %47 = dma.hbm_to_vmem [thread:$0]  %s43_s1, 32, %s45_s26, [#allocation6]  }
   0xb   :  { %360 = dma.done.wait [#allocation3], 512  }
   0xc   :  { %361 = vsyncadd [#allocation3], 4294966784 }
   0xd   :  { %362 = dma.done.wait [#allocation6], 8224  }
   0xe   :  { %363 = vsyncadd [#allocation6], 4294959072  ;;  %v95_v0 = vld [vmem:[#allocation5 + $0xf8] sm:$0xff]  ;;  %v93_v1 = vld [vmem:[#allocation5 + $0xe8] sm:$0xff]  ;;  %s371_s2 = smov [#allocation8]   ;;  %s244_s30 = sshll.u32 %s416_s3, 4  ;;  %s245_s30 = int_to_ptr.hbm [resolvable:$true] %s244_s30 }
   0xf   :  { %v127_v2 = vld [vmem:[#allocation5 + $0x1f8] sm:$0xff]  ;;  %180 = vmatpush.msra.mxu2 %v95_v0  ;;  %v94_v3 = vld [vmem:[#allocation5 + $0xf0] sm:$0xff]  ;;  %v125_v4 = vld [vmem:[#allocation5 + $0x1e8] sm:$0xff]  ;;  %s242_s27 = sshll.u32 %s371_s2, 4  ;;  %s243_s27 = int_to_ptr.vmem [resolvable:$true] %s242_s27 }
  0x10   :  { %203 = vmatpush.msra.mxu3 %v127_v2  ;;  %134 = vmatpush.msra.mxu0 %v94_v3  ;;  %v91_v5 = vld [vmem:[#allocation5 + $0xd8] sm:$0xff]  ;;  %v92_v6 = vld [vmem:[#allocation5 + $0xe0] sm:$0xff]  ;;  %v126_v7 = vld [vmem:[#allocation5 + $0x1f0] sm:$0xff] }
  0x11   :  { %181 = vmatpush.msra.mxu2 %v93_v1  ;;  %v123_v8 = vld [vmem:[#allocation5 + $0x1d8] sm:$0xff]  ;;  %v90_v9 = vld [vmem:[#allocation5 + $0xd0] sm:$0xff]  ;;  %v124_v10 = vld [vmem:[#allocation5 + $0x1e0] sm:$0xff]  ;;  %157 = vmatpush.msra.mxu1 %v126_v7 }
  0x12   :  { %204 = vmatpush.msra.mxu3 %v125_v4  ;;  %135 = vmatpush.msra.mxu0 %v92_v6  ;;  %v89_v11 = vld [vmem:[#allocation5 + $0xc8] sm:$0xff]  ;;  %v88_v13 = vld [vmem:[#allocation5 + $0xc0] sm:$0xff]  ;;  %v122_v14 = vld [vmem:[#allocation5 + $0x1d0] sm:$0xff] }
  0x13   :  { %v121_v12 = vld [vmem:[#allocation5 + $0x1c8] sm:$0xff]  ;;  %182 = vmatpush.msra.mxu2 %v91_v5  ;;  %158 = vmatpush.msra.mxu1 %v124_v10  ;;  %v87_v15 = vld [vmem:[#allocation5 + $0xb8] sm:$0xff]  ;;  %v86_v17 = vld [vmem:[#allocation5 + $0xb0] sm:$0xff] }
  0x14   :  { %205 = vmatpush.msra.mxu3 %v123_v8  ;;  %136 = vmatpush.msra.mxu0 %v90_v9  ;;  %v119_v16 = vld [vmem:[#allocation5 + $0x1b8] sm:$0xff]  ;;  %v120_v18 = vld [vmem:[#allocation5 + $0x1c0] sm:$0xff]  ;;  %v85_v19 = vld [vmem:[#allocation5 + $0xa8] sm:$0xff] }
  0x15   :  { %183 = vmatpush.msra.mxu2 %v89_v11  ;;  %159 = vmatpush.msra.mxu1 %v122_v14  ;;  %v117_v20 = vld [vmem:[#allocation5 + $0x1a8] sm:$0xff]  ;;  %v84_v21 = vld [vmem:[#allocation5 + $0xa0] sm:$0xff]  ;;  %v118_v22 = vld [vmem:[#allocation5 + $0x1b0] sm:$0xff] }
  0x16   :  { %206 = vmatpush.msra.mxu3 %v121_v12  ;;  %137 = vmatpush.msra.mxu0 %v88_v13  ;;  %v83_v23 = vld [vmem:[#allocation5 + $0x98] sm:$0xff]  ;;  %v82_v25 = vld [vmem:[#allocation5 + $0x90] sm:$0xff]  ;;  %v116_v26 = vld [vmem:[#allocation5 + $0x1a0] sm:$0xff] }
  0x17   :  { %184 = vmatpush.msra.mxu2 %v87_v15  ;;  %160 = vmatpush.msra.mxu1 %v120_v18  ;;  %v115_v24 = vld [vmem:[#allocation5 + $0x198] sm:$0xff]  ;;  %v81_v27 = vld [vmem:[#allocation5 + $0x88] sm:$0xff]  ;;  %v80_v29 = vld [vmem:[#allocation5 + $0x80] sm:$0xff] }
  0x18   :  { %207 = vmatpush.msra.mxu3 %v119_v16  ;;  %138 = vmatpush.msra.mxu0 %v86_v17  ;;  %v113_v28 = vld [vmem:[#allocation5 + $0x188] sm:$0xff]  ;;  %v114_v30 = vld [vmem:[#allocation5 + $0x190] sm:$0xff]  ;;  %v79_v31 = vld [vmem:[#allocation5 + $0x78] sm:$0xff] }
  0x19   :  { %185 = vmatpush.msra.mxu2 %v85_v19  ;;  %161 = vmatpush.msra.mxu1 %v118_v22  ;;  %v111_v32 = vld [vmem:[#allocation5 + $0x178] sm:$0xff]  ;;  %v78_v33 = vld [vmem:[#allocation5 + $0x70] sm:$0xff]  ;;  %v112_v34 = vld [vmem:[#allocation5 + $0x180] sm:$0xff] }
  0x1a   :  { %208 = vmatpush.msra.mxu3 %v117_v20  ;;  %139 = vmatpush.msra.mxu0 %v84_v21  ;;  %v77_v35 = vld [vmem:[#allocation5 + $0x68] sm:$0xff]  ;;  %v76_v37 = vld [vmem:[#allocation5 + $0x60] sm:$0xff]  ;;  %v110_v38 = vld [vmem:[#allocation5 + $0x170] sm:$0xff] }
  0x1b   :  { %186 = vmatpush.msra.mxu2 %v83_v23  ;;  %162 = vmatpush.msra.mxu1 %v116_v26  ;;  %v109_v36 = vld [vmem:[#allocation5 + $0x168] sm:$0xff]  ;;  %v75_v39 = vld [vmem:[#allocation5 + $0x58] sm:$0xff]  ;;  %v74_v41 = vld [vmem:[#allocation5 + $0x50] sm:$0xff] }
  0x1c   :  { %209 = vmatpush.msra.mxu3 %v115_v24  ;;  %140 = vmatpush.msra.mxu0 %v82_v25  ;;  %v107_v40 = vld [vmem:[#allocation5 + $0x158] sm:$0xff]  ;;  %v108_v42 = vld [vmem:[#allocation5 + $0x160] sm:$0xff]  ;;  %v73_v43 = vld [vmem:[#allocation5 + $0x48] sm:$0xff] }
  0x1d   :  { %187 = vmatpush.msra.mxu2 %v81_v27  ;;  %163 = vmatpush.msra.mxu1 %v114_v30  ;;  %v105_v44 = vld [vmem:[#allocation5 + $0x148] sm:$0xff]  ;;  %v72_v45 = vld [vmem:[#allocation5 + $0x40] sm:$0xff]  ;;  %v106_v46 = vld [vmem:[#allocation5 + $0x150] sm:$0xff] }
  0x1e   :  { %210 = vmatpush.msra.mxu3 %v113_v28  ;;  %141 = vmatpush.msra.mxu0 %v80_v29  ;;  %v71_v47 = vld [vmem:[#allocation5 + $0x38] sm:$0xff]  ;;  %v70_v49 = vld [vmem:[#allocation5 + $0x30] sm:$0xff]  ;;  %v104_v50 = vld [vmem:[#allocation5 + $0x140] sm:$0xff] }
  0x1f   :  { %188 = vmatpush.msra.mxu2 %v79_v31  ;;  %164 = vmatpush.msra.mxu1 %v112_v34  ;;  %v103_v48 = vld [vmem:[#allocation5 + $0x138] sm:$0xff]  ;;  %v69_v51 = vld [vmem:[#allocation5 + $0x28] sm:$0xff]  ;;  %v68_v53 = vld [vmem:[#allocation5 + $0x20] sm:$0xff] }
  0x20   :  { %211 = vmatpush.msra.mxu3 %v111_v32  ;;  %142 = vmatpush.msra.mxu0 %v78_v33  ;;  %v101_v52 = vld [vmem:[#allocation5 + $0x128] sm:$0xff]  ;;  %v102_v54 = vld [vmem:[#allocation5 + $0x130] sm:$0xff]  ;;  %v67_v55 = vld [vmem:[#allocation5 + $0x18] sm:$0xff] }
  0x21   :  { %189 = vmatpush.msra.mxu2 %v77_v35  ;;  %165 = vmatpush.msra.mxu1 %v110_v38  ;;  %v99_v56 = vld [vmem:[#allocation5 + $0x118] sm:$0xff]  ;;  %v66_v57 = vld [vmem:[#allocation5 + $0x10] sm:$0xff]  ;;  %v100_v58 = vld [vmem:[#allocation5 + $0x120] sm:$0xff] }
  0x22   :  { %212 = vmatpush.msra.mxu3 %v109_v36  ;;  %143 = vmatpush.msra.mxu0 %v76_v37  ;;  %v65_v59 = vld [vmem:[#allocation5 + $0x8] sm:$0xff]  ;;  %v60_v61 = vld [vmem:[#allocation2] sm:$0xff]  ;;  %v98_v0 = vld [vmem:[#allocation5 + $0x110] sm:$0xff] }
  0x23   :  { %190 = vmatpush.msra.mxu2 %v75_v39  ;;  %166 = vmatpush.msra.mxu1 %v108_v42  ;;  %v97_v60 = vld [vmem:[#allocation5 + $0x108] sm:$0xff]  ;;  %v64_v63 = vld [vmem:[#allocation5] sm:$0xff]  ;;  %v62_v2 = vld [vmem:[#allocation2 + $0x10] sm:$0xff] }
  0x24   :  { %213 = vmatpush.msra.mxu3 %v107_v40  ;;  %144 = vmatpush.msra.mxu0 %v74_v41  ;;  %v61_v62 = vld [vmem:[#allocation2 + $0x8] sm:$0xff]  ;;  %v96_v1 = vld [vmem:[#allocation5 + $0x100] sm:$0xff]  ;;  %v63_v3 = vld [vmem:[#allocation2 + $0x18] sm:$0xff] }
  0x25   :  { %191 = vmatpush.msra.mxu2 %v73_v43  ;;  %167 = vmatpush.msra.mxu1 %v106_v46  ;;  %v128_v4 = vld [vmem:[#allocation7] sm:$0x3] }
  0x26   :  { %214 = vmatpush.msra.mxu3 %v105_v44  ;;  %145 = vmatpush.msra.mxu0 %v72_v45  ;;  %v130_v5 = vperm.slane %v128_v4, 0  ;;  %v131_v8 = vperm.slane %v128_v4, 1 }
  0x27   :  { %192 = vmatpush.msra.mxu2 %v71_v47  ;;  %168 = vmatpush.msra.mxu1 %v104_v50 }
  0x28   :  { %215 = vmatpush.msra.mxu3 %v103_v48  ;;  %146 = vmatpush.msra.mxu0 %v70_v49 }
  0x29   :  { %193 = vmatpush.msra.mxu2 %v69_v51  ;;  %169 = vmatpush.msra.mxu1 %v102_v54 }
  0x2a   :  { %216 = vmatpush.msra.mxu3 %v101_v52  ;;  %147 = vmatpush.msra.mxu0 %v68_v53 }
  0x2b   :  { %194 = vmatpush.msra.mxu2 %v67_v55  ;;  %170 = vmatpush.msra.mxu1 %v100_v58 }
  0x2c   :  { %217 = vmatpush.msra.mxu3 %v99_v56  ;;  %148 = vmatpush.msra.mxu0 %v66_v57 }
  0x2d   :  { %195 = vmatpush.msra.mxu2 %v65_v59  ;;  %171 = vmatpush.msra.mxu1 %v98_v0 }
  0x2e   :  { %218 = vmatpush.msra.mxu3 %v97_v60  ;;  %196 = vmatmul.f32.vlgmr.msra.gmra.mxu2 %v60_v61 }
  0x2f   :  { %219 = vmatmul.f32.vlgmr.msra.gmra.mxu3 %v61_v62  ;;  %149 = vmatpush.msra.mxu0 %v64_v63 }
  0x30   :  { %150 = vmatmul.f32.vlgmr.msra.gmra.mxu0 %v60_v61  ;;  %172 = vmatpush.msra.mxu1 %v96_v1 }
  0x31   :  { %173 = vmatmul.f32.vlgmr.msra.gmra.mxu1 %v61_v62 }
  0x36   :  { %199 = vmatmul.f32.gmra.mxu2 %v62_v2 }
  0x37   :  { %222 = vmatmul.f32.gmra.mxu3 %v63_v3 }
  0x38   :  { %153 = vmatmul.f32.gmra.mxu0 %v62_v2 }
  0x39   :  { %176 = vmatmul.f32.gmra.mxu1 %v63_v3 }
  0xad   :  { %v151_v6 = vpop.f32.mrf.mxu0 }
  0xae   :  { %v152_v7 = vadd.f32 %v151_v6, %v130_v5  ;;  %v174_v9 = vpop.f32.mrf.mxu1 }
  0xb0   :  { %v175_v10 = vadd.f32 %v174_v9, %v152_v7 }
  0xb1   :  { %v197_v11 = vpop.f32.mrf.mxu2 }
  0xb2   :  { %v220_v12 = vpop.f32.mrf.mxu3  ;;  %v226_v13 = vmul.f32 0.1, %v175_v10  ;;  %v198_v14 = vadd.f32 %v197_v11, %v131_v8 }
  0xb4   :  { %v230_v15 = vmax.f32 %v175_v10, %v226_v13  ;;  %v221_v16 = vadd.f32 %v220_v12, %v198_v14 }
  0xb5   :  { %v154_v17 = vpop.f32.mrf.mxu0 }
  0xb6   :  { %234 = vst [vmem:[#allocation8] sm:$0xff] %v230_v15  ;;  %v227_v18 = vmul.f32 0.1, %v221_v16  ;;  %v155_v19 = vadd.f32 %v154_v17, %v130_v5  ;;  %v177_v20 = vpop.f32.mrf.mxu1 }
  0xb8   :  { %v231_v21 = vmax.f32 %v221_v16, %v227_v18  ;;  %v178_v22 = vadd.f32 %v177_v20, %v155_v19 }
  0xb9   :  { %v200_v23 = vpop.f32.mrf.mxu2 }
  0xba   :  { %v223_v24 = vpop.f32.mrf.mxu3  ;;  %235 = vst [vmem:[#allocation8 + $0x8] sm:$0xff] %v231_v21  ;;  %v228_v25 = vmul.f32 0.1, %v178_v22  ;;  %v201_v26 = vadd.f32 %v200_v23, %v131_v8 }
  0xbc   :  { %v232_v27 = vmax.f32 %v178_v22, %v228_v25  ;;  %v224_v28 = vadd.f32 %v223_v24, %v201_v26 }
  0xbe   :  { %236 = vst [vmem:[#allocation8 + $0x10] sm:$0xff] %v232_v27  ;;  %v229_v29 = vmul.f32 0.1, %v224_v28 }
  0xc0   :  { %v233_v30 = vmax.f32 %v224_v28, %v229_v29 }
  0xc2   :  { %237 = vst [vmem:[#allocation8 + $0x18] sm:$0xff] %v233_v30 }
  0xc3   :  { %250 = dma.vmem_to_hbm [thread:$0]  %s243_s27, 512, %s245_s30, [#allocation4], %s367_s20, %s367_s20, %s368_s21  }
  0xc4   :  { %364 = dma.done.wait [#allocation4], 512  }
  0xc5   :  { %365 = vsyncadd [#allocation4], 4294966784 }
  0xc6   :  { %255 = vsyncpa [#allocation3], 1 }
  0xc7   :  { %256 = vsyncpa [#allocation6], 1 }
  0xc8   :  { %257 = vsyncpa [#allocation4], 1 }

</bundles_post_ra>
